<compile_context>
chip_gen: v5e
topology: v5e:2x2
jax: 0.10.0
libtpu: 0.0.40
codegen_flags: <defaults>
</compile_context>

<pallas_src>
import jax
import jax.numpy as jnp
from jax.experimental import pallas as pl
from jax.experimental.pallas import tpu as pltpu


def _round_up(x, m):
    return ((x + m - 1) // m) * m


def sub_tcn_forward(S_e, S_i, params, C_syn_e, C_syn_i, T_no):
    batch, T_data, E_no = S_e.shape
    I_no = S_i.shape[-1]
    sub_no = C_syn_e.shape[0]
    hid_no = params["W_layer2"].shape[1]
    C_in = E_no + I_no
    R = 2 * sub_no                       # stacked (excitatory, inhibitory) current rows
    HN = sub_no * hid_no

    f32 = jnp.float32

    # lane-dense time axis: pad T_data up to a multiple of 128 (causal -> padded tail
    # does not affect valid outputs; it is sliced off below).
    T_lane = _round_up(T_data, 128)
    # lane-aligned leading zero region for the causal padding scratch
    PAD_LEAD = _round_up(T_no - 1, 128)

    # ---- glue / one-time parameter packing (tiny, done once in XLA) ----
    # fold exp(scale) and the -1 into the connectivity; fuse e/i matmuls into one.
    ce_scaled = C_syn_e.astype(f32) * jnp.exp(params["E_scale"].astype(f32))[None, :]
    ci_scaled = -(C_syn_i.astype(f32) * jnp.exp(params["I_scale"].astype(f32))[None, :])
    c_comb = jnp.zeros((R, C_in), f32)
    c_comb = c_comb.at[:sub_no, :E_no].set(ce_scaled)
    c_comb = c_comb.at[sub_no:, E_no:].set(ci_scaled)

    # grouped causal conv == one block-diagonal matmul over im2col'd lags.
    eye_s = jnp.eye(sub_no, dtype=f32)
    we = params["W_e_layer1"].reshape(sub_no, hid_no, T_no).astype(f32)
    wi = params["W_i_layer1"].reshape(sub_no, hid_no, T_no).astype(f32)
    w_ei = jnp.stack([we, wi], axis=-1)                                    # (s, h, j, ei)
    w1_flat = (w_ei[:, :, :, :, None] * eye_s[:, None, None, None, :])     # (s, h, j, ei, s')
    w1_flat = w1_flat.reshape(HN, T_no * R)

    b_flat = params["b_layer1"].reshape(HN, 1).astype(f32)

    # layer2 (per-sub 1x1 conv) + final sum fused into one (sub_no+1, HN) matmul.
    w2e = jnp.exp(params["W_layer2"].astype(f32))                          # (sub_no, hid_no)
    w2_block = (w2e[:, None, :] * eye_s[:, :, None]).reshape(sub_no, HN)
    w2_full = jnp.concatenate([w2_block, w2e.reshape(1, HN)], axis=0)      # (sub_no+1, HN)

    vo = params["V_o"].reshape(1, 1).astype(f32)

    # stacked, channels-first, lane-padded spike input: (batch, E_no+I_no, T_lane)
    x = jnp.concatenate(
        [jnp.transpose(S_e, (0, 2, 1)).astype(f32),
         jnp.transpose(S_i, (0, 2, 1)).astype(f32)], axis=1)
    x = jnp.pad(x, ((0, 0), (0, 0), (0, T_lane - T_data)))

    def kernel(x_ref, c_ref, w1_ref, b_ref, w2_ref, vo_ref,
               final_ref, subout_ref, l1in_ref,
               pad_ref, col_ref):
        # 1) fused, pre-scaled connectivity matmul (single MXU issue)
        syn = jnp.dot(c_ref[...], x_ref[0], preferred_element_type=f32)        # (R, T_lane)

        # 2) causal zero padding: only the T_no-1 prefix gets zeros; the data store
        #    lands at a lane-aligned offset (PAD_LEAD is a multiple of 128).
        if T_no > 1:
            pad_ref[:, PAD_LEAD - (T_no - 1):PAD_LEAD] = jnp.zeros((R, T_no - 1), f32)
        pad_ref[:, PAD_LEAD:] = syn

        # 3) im2col of the T_no causal lags (static unroll)
        for j in range(T_no):
            col_ref[j * R:(j + 1) * R, :] = pad_ref[:, PAD_LEAD - j:PAD_LEAD - j + T_lane]

        # 4) grouped causal conv as ONE block-diagonal MXU matmul (+ bias)
        l1in = jnp.dot(w1_ref[...], col_ref[...], preferred_element_type=f32) + b_ref[...]
        l1out = jnp.tanh(l1in)                                                 # EUP

        # 5) per-sub 1x1 conv + final reduction as ONE MXU matmul
        outm = jnp.dot(w2_ref[...], l1out, preferred_element_type=f32)         # (sub_no+1, T_lane)

        l1in_ref[0] = l1in
        subout_ref[0] = outm[:sub_no, :]
        final_ref[0] = outm[sub_no:sub_no + 1, :] + vo_ref[0, 0]

    out_shape = [
        jax.ShapeDtypeStruct((batch, 1, T_lane), f32),
        jax.ShapeDtypeStruct((batch, sub_no, T_lane), f32),
        jax.ShapeDtypeStruct((batch, HN, T_lane), f32),
    ]

    # VMEM budget (double-buffered IO blocks + params + scratch) -> scoped limit.
    nb = 4
    io_block = (C_in + 1 + sub_no + HN) * T_lane * nb
    param_block = (R * C_in + HN * T_no * R + HN + (sub_no + 1) * HN + 1) * nb
    scratch_bytes = (R * (PAD_LEAD + T_lane) + T_no * R * T_lane) * nb
    est = 2 * (io_block + param_block) + scratch_bytes
    vmem_limit = int(min(56 * 2**20, max(32 * 2**20, int(2.5 * est))))
    # NOTE: for extremely long traces (blocks approaching v7x's 64 MiB VMEM), add a
    # T_data grid axis with a T_no-1 causal-halo carry; not needed at these sizes.

    grid_spec = pltpu.PrefetchScalarGridSpec(
        num_scalar_prefetch=0,
        grid=(batch,),
        in_specs=[
            pl.BlockSpec((1, C_in, T_lane), lambda b: (b, 0, 0)),
            pl.BlockSpec((R, C_in), lambda b: (0, 0)),
            pl.BlockSpec((HN, T_no * R), lambda b: (0, 0)),
            pl.BlockSpec((HN, 1), lambda b: (0, 0)),
            pl.BlockSpec((sub_no + 1, HN), lambda b: (0, 0)),
            pl.BlockSpec((1, 1), lambda b: (0, 0)),
        ],
        out_specs=[
            pl.BlockSpec((1, 1, T_lane), lambda b: (b, 0, 0)),
            pl.BlockSpec((1, sub_no, T_lane), lambda b: (b, 0, 0)),
            pl.BlockSpec((1, HN, T_lane), lambda b: (b, 0, 0)),
        ],
        scratch_shapes=[
            pltpu.VMEM((R, PAD_LEAD + T_lane), f32),      # causal-padded currents
            pltpu.VMEM((T_no * R, T_lane), f32),          # im2col lag buffer
        ],
    )

    final_k, subout_k, l1in_k = pl.pallas_call(
        kernel,
        out_shape=out_shape,
        grid_spec=grid_spec,
        compiler_params=pltpu.CompilerParams(
            dimension_semantics=("parallel",),
            vmem_limit_bytes=vmem_limit,
        ),
    )(x, c_comb, w1_flat, b_flat, w2_full, vo)

    # --- glue: back to PyTorch output conventions, drop lane padding ---
    final = final_k[:, 0, :T_data]                                    # (batch, T_data)
    sub_out = jnp.transpose(subout_k[:, :, :T_data], (0, 2, 1))       # (batch, T_data, sub_no)
    layer1_in = l1in_k[:, :, :T_data]                                 # (batch, sub*hid, T_data)
    return final, sub_out, layer1_in


def ref_forward(S_e, S_i, params, C_syn_e, C_syn_i, T_no):
    """Pure-JAX reference mirroring the PyTorch module (lax grouped convs)."""
    sub_no = C_syn_e.shape[0]
    Se = S_e * jnp.exp(params["E_scale"])[None, None, :]
    Si = S_i * jnp.exp(params["I_scale"])[None, None, :] * -1.0
    syn_e = jnp.einsum("bte,se->bts", Se, C_syn_e)
    syn_i = jnp.einsum("bti,si->bts", Si, C_syn_i)
    pad_e = jnp.pad(syn_e, ((0, 0), (T_no - 1, 0), (0, 0))).transpose(0, 2, 1)
    pad_i = jnp.pad(syn_i, ((0, 0), (T_no - 1, 0), (0, 0))).transpose(0, 2, 1)
    ke = jnp.flip(params["W_e_layer1"], axis=1)[:, None, :]
    ki = jnp.flip(params["W_i_layer1"], axis=1)[:, None, :]
    dn = ("NCH", "OIH", "NCH")
    conv_e = jax.lax.conv_general_dilated(pad_e, ke, (1,), "VALID",
                                          dimension_numbers=dn, feature_group_count=sub_no)
    conv_i = jax.lax.conv_general_dilated(pad_i, ki, (1,), "VALID",
                                          dimension_numbers=dn, feature_group_count=sub_no)
    l1in = conv_e + conv_i + params["b_layer1"][None, :, None]
    l1out = jnp.tanh(l1in)
    w2 = jnp.exp(params["W_layer2"])[:, :, None]
    sub_out = jax.lax.conv_general_dilated(l1out, w2, (1,), "VALID",
                                           dimension_numbers=dn,
                                           feature_group_count=sub_no).transpose(0, 2, 1)
    final = jnp.sum(sub_out, -1) + params["V_o"][0]
    return final, sub_out, l1in


if __name__ == "__main__":
    batch, T_data = 2, 16
    E_no, I_no = 8, 6
    sub_no, hid_no, T_no = 4, 5, 8

    key = jax.random.PRNGKey(0)
    k = jax.random.split(key, 10)

    # deterministic synthetic connectivity (one-hot synapse -> subunit assignment)
    C_syn_e = (jnp.arange(E_no)[None, :] % sub_no == jnp.arange(sub_no)[:, None]).astype(jnp.float32)
    C_syn_i = (jnp.arange(I_no)[None, :] % sub_no == jnp.arange(sub_no)[:, None]).astype(jnp.float32)

    # deterministic synthetic parameters (shapes from Sub_TCN.__init__)
    params = {
        "E_scale": 0.1 * jax.random.normal(k[0], (E_no,), jnp.float32),
        "I_scale": 0.1 * jax.random.normal(k[1], (I_no,), jnp.float32),
        "W_e_layer1": 0.01 * jax.random.normal(k[2], (sub_no * hid_no, T_no), jnp.float32),
        "W_i_layer1": 0.01 * jax.random.normal(k[3], (sub_no * hid_no, T_no), jnp.float32),
        "W_layer2": -1.0 + 0.1 * jax.random.normal(k[4], (sub_no, hid_no), jnp.float32),
        "b_layer1": 0.01 * jax.random.normal(k[5], (sub_no * hid_no,), jnp.float32),
        "V_o": 0.1 * jax.random.normal(k[6], (1,), jnp.float32),
    }

    # spike-train-like inputs (PyTorch convention: (batch, T_data, n_syn))
    S_e = jax.random.bernoulli(k[7], 0.3, (batch, T_data, E_no)).astype(jnp.float32)
    S_i = jax.random.bernoulli(k[8], 0.3, (batch, T_data, I_no)).astype(jnp.float32)

    final, sub_out, layer1_in = sub_tcn_forward(S_e, S_i, params, C_syn_e, C_syn_i, T_no)
    jax.block_until_ready((final, sub_out, layer1_in))

    fr, sr, lr = ref_forward(S_e, S_i, params, C_syn_e, C_syn_i, T_no)
    assert jnp.allclose(final, fr, atol=1e-4, rtol=1e-4)
    assert jnp.allclose(sub_out, sr, atol=1e-4, rtol=1e-4)
    assert jnp.allclose(layer1_in, lr, atol=1e-4, rtol=1e-4)

    print("KERNEL_OK")
</pallas_src>

<mosaic_0001>
module attributes {stable_mosaic.version = 11 : i64} {
  func.func @kernel(%arg0: i32, %arg1: memref<1x14x128xf32, #tpu.memory_space<vmem>>, %arg2: memref<8x14xf32, #tpu.memory_space<vmem>>, %arg3: memref<20x64xf32, #tpu.memory_space<vmem>>, %arg4: memref<20x1xf32, #tpu.memory_space<vmem>>, %arg5: memref<5x20xf32, #tpu.memory_space<vmem>>, %arg6: memref<1x1xf32, #tpu.memory_space<vmem>>, %arg7: memref<1x1x128xf32, #tpu.memory_space<vmem>>, %arg8: memref<1x4x128xf32, #tpu.memory_space<vmem>>, %arg9: memref<1x20x128xf32, #tpu.memory_space<vmem>>, %arg10: memref<8x256xf32, #tpu.memory_space<vmem>>, %arg11: memref<64x128xf32, #tpu.memory_space<vmem>>) attributes {dimension_semantics = [#tpu.dimension_semantics<parallel>], iteration_bounds = array<i64: 2>, scalar_prefetch = 0 : i64, scratch_operands = 2 : i64, tpu.core_type = #tpu.core_type<tc>, window_params = [{transform_indices = @transform_0, window_bounds = array<i64: 1, 14, 128>}, {pipeline_mode = #tpu.pipeline_mode<synchronous>, transform_indices = @transform_1, window_bounds = array<i64: 8, 14>}, {pipeline_mode = #tpu.pipeline_mode<synchronous>, transform_indices = @transform_2, window_bounds = array<i64: 20, 64>}, {pipeline_mode = #tpu.pipeline_mode<synchronous>, transform_indices = @transform_3, window_bounds = array<i64: 20, 1>}, {pipeline_mode = #tpu.pipeline_mode<synchronous>, transform_indices = @transform_4, window_bounds = array<i64: 5, 20>}, {pipeline_mode = #tpu.pipeline_mode<synchronous>, transform_indices = @transform_5, window_bounds = array<i64: 1, 1>}, {transform_indices = @transform_6, window_bounds = array<i64: 1, 1, 128>}, {transform_indices = @transform_7, window_bounds = array<i64: 1, 4, 128>}, {transform_indices = @transform_8, window_bounds = array<i64: 1, 20, 128>}]} {
    %c0 = arith.constant 0 : index
    %c0_0 = arith.constant 0 : index
    %0 = vector.load %arg2[%c0, %c0_0] : memref<8x14xf32, #tpu.memory_space<vmem>>, vector<8x14xf32>
    %c0_1 = arith.constant 0 : index
    %c0_2 = arith.constant 0 : index
    %c0_3 = arith.constant 0 : index
    %1 = vector.load %arg1[%c0_1, %c0_2, %c0_3] : memref<1x14x128xf32, #tpu.memory_space<vmem>>, vector<1x14x128xf32>
    %2 = vector.shape_cast %1 : vector<1x14x128xf32> to vector<14x128xf32>
    %cst = arith.constant dense<0.000000e+00> : vector<8x128xf32>
    %3 = tpu.matmul %0, %2, %cst {dimension_numbers = #tpu.dot_dimension_numbers<[1], [0], [0], [1], [0, 0, 1, 1], [], []>} : vector<8x14xf32>, vector<14x128xf32>, vector<8x128xf32> -> vector<8x128xf32>
    %cst_4 = arith.constant 0.000000e+00 : f32
    %4 = vector.broadcast %cst_4 : f32 to vector<8x7xf32>
    %c0_5 = arith.constant 0 : index
    %c121 = arith.constant 121 : index
    %5 = vector.load %arg10[%c0_5, %c121] : memref<8x256xf32, #tpu.memory_space<vmem>>, vector<8x7xf32>
    tpu.vector_store %arg10[%c0_5, %c121], %4 {strides = array<i32>} : memref<8x256xf32, #tpu.memory_space<vmem>>, vector<8x7xf32>,
    %c0_6 = arith.constant 0 : index
    %c128 = arith.constant 128 : index
    %6 = vector.load %arg10[%c0_6, %c128] : memref<8x256xf32, #tpu.memory_space<vmem>>, vector<8x128xf32>
    tpu.vector_store %arg10[%c0_6, %c128], %3 {strides = array<i32>} : memref<8x256xf32, #tpu.memory_space<vmem>>, vector<8x128xf32>,
    %c0_7 = arith.constant 0 : index
    %c128_8 = arith.constant 128 : index
    %7 = vector.load %arg10[%c0_7, %c128_8] : memref<8x256xf32, #tpu.memory_space<vmem>>, vector<8x128xf32>
    %c0_9 = arith.constant 0 : index
    %c0_10 = arith.constant 0 : index
    %8 = vector.load %arg11[%c0_9, %c0_10] : memref<64x128xf32, #tpu.memory_space<vmem>>, vector<8x128xf32>
    tpu.vector_store %arg11[%c0_9, %c0_10], %7 {strides = array<i32>} : memref<64x128xf32, #tpu.memory_space<vmem>>, vector<8x128xf32>,
    %c0_11 = arith.constant 0 : index
    %c127 = arith.constant 127 : index
    %9 = vector.load %arg10[%c0_11, %c127] : memref<8x256xf32, #tpu.memory_space<vmem>>, vector<8x128xf32>
    %c8 = arith.constant 8 : index
    %c0_12 = arith.constant 0 : index
    %10 = vector.load %arg11[%c8, %c0_12] : memref<64x128xf32, #tpu.memory_space<vmem>>, vector<8x128xf32>
    tpu.vector_store %arg11[%c8, %c0_12], %9 {strides = array<i32>} : memref<64x128xf32, #tpu.memory_space<vmem>>, vector<8x128xf32>,
    %c0_13 = arith.constant 0 : index
    %c126 = arith.constant 126 : index
    %11 = vector.load %arg10[%c0_13, %c126] : memref<8x256xf32, #tpu.memory_space<vmem>>, vector<8x128xf32>
    %c16 = arith.constant 16 : index
    %c0_14 = arith.constant 0 : index
    %12 = vector.load %arg11[%c16, %c0_14] : memref<64x128xf32, #tpu.memory_space<vmem>>, vector<8x128xf32>
    tpu.vector_store %arg11[%c16, %c0_14], %11 {strides = array<i32>} : memref<64x128xf32, #tpu.memory_space<vmem>>, vector<8x128xf32>,
    %c0_15 = arith.constant 0 : index
    %c125 = arith.constant 125 : index
    %13 = vector.load %arg10[%c0_15, %c125] : memref<8x256xf32, #tpu.memory_space<vmem>>, vector<8x128xf32>
    %c24 = arith.constant 24 : index
    %c0_16 = arith.constant 0 : index
    %14 = vector.load %arg11[%c24, %c0_16] : memref<64x128xf32, #tpu.memory_space<vmem>>, vector<8x128xf32>
    tpu.vector_store %arg11[%c24, %c0_16], %13 {strides = array<i32>} : memref<64x128xf32, #tpu.memory_space<vmem>>, vector<8x128xf32>,
    %c0_17 = arith.constant 0 : index
    %c124 = arith.constant 124 : index
    %15 = vector.load %arg10[%c0_17, %c124] : memref<8x256xf32, #tpu.memory_space<vmem>>, vector<8x128xf32>
    %c32 = arith.constant 32 : index
    %c0_18 = arith.constant 0 : index
    %16 = vector.load %arg11[%c32, %c0_18] : memref<64x128xf32, #tpu.memory_space<vmem>>, vector<8x128xf32>
    tpu.vector_store %arg11[%c32, %c0_18], %15 {strides = array<i32>} : memref<64x128xf32, #tpu.memory_space<vmem>>, vector<8x128xf32>,
    %c0_19 = arith.constant 0 : index
    %c123 = arith.constant 123 : index
    %17 = vector.load %arg10[%c0_19, %c123] : memref<8x256xf32, #tpu.memory_space<vmem>>, vector<8x128xf32>
    %c40 = arith.constant 40 : index
    %c0_20 = arith.constant 0 : index
    %18 = vector.load %arg11[%c40, %c0_20] : memref<64x128xf32, #tpu.memory_space<vmem>>, vector<8x128xf32>
    tpu.vector_store %arg11[%c40, %c0_20], %17 {strides = array<i32>} : memref<64x128xf32, #tpu.memory_space<vmem>>, vector<8x128xf32>,
    %c0_21 = arith.constant 0 : index
    %c122 = arith.constant 122 : index
    %19 = vector.load %arg10[%c0_21, %c122] : memref<8x256xf32, #tpu.memory_space<vmem>>, vector<8x128xf32>
    %c48 = arith.constant 48 : index
    %c0_22 = arith.constant 0 : index
    %20 = vector.load %arg11[%c48, %c0_22] : memref<64x128xf32, #tpu.memory_space<vmem>>, vector<8x128xf32>
    tpu.vector_store %arg11[%c48, %c0_22], %19 {strides = array<i32>} : memref<64x128xf32, #tpu.memory_space<vmem>>, vector<8x128xf32>,
    %c0_23 = arith.constant 0 : index
    %c121_24 = arith.constant 121 : index
    %21 = vector.load %arg10[%c0_23, %c121_24] : memref<8x256xf32, #tpu.memory_space<vmem>>, vector<8x128xf32>
    %c56 = arith.constant 56 : index
    %c0_25 = arith.constant 0 : index
    %22 = vector.load %arg11[%c56, %c0_25] : memref<64x128xf32, #tpu.memory_space<vmem>>, vector<8x128xf32>
    tpu.vector_store %arg11[%c56, %c0_25], %21 {strides = array<i32>} : memref<64x128xf32, #tpu.memory_space<vmem>>, vector<8x128xf32>,
    %c0_26 = arith.constant 0 : index
    %c0_27 = arith.constant 0 : index
    %23 = vector.load %arg3[%c0_26, %c0_27] : memref<20x64xf32, #tpu.memory_space<vmem>>, vector<20x64xf32>
    %c0_28 = arith.constant 0 : index
    %c0_29 = arith.constant 0 : index
    %24 = vector.load %arg11[%c0_28, %c0_29] : memref<64x128xf32, #tpu.memory_space<vmem>>, vector<64x128xf32>
    %cst_30 = arith.constant dense<0.000000e+00> : vector<20x128xf32>
    %25 = tpu.matmul %23, %24, %cst_30 {dimension_numbers = #tpu.dot_dimension_numbers<[1], [0], [0], [1], [0, 0, 1, 1], [], []>} : vector<20x64xf32>, vector<64x128xf32>, vector<20x128xf32> -> vector<20x128xf32>
    %c0_31 = arith.constant 0 : index
    %c0_32 = arith.constant 0 : index
    %26 = vector.load %arg4[%c0_31, %c0_32] : memref<20x1xf32, #tpu.memory_space<vmem>>, vector<20x1xf32>
    %27 = vector.broadcast %26 : vector<20x1xf32> to vector<20x128xf32>
    %28 = arith.addf %25, %27 : vector<20x128xf32>
    %29 = math.tanh %28 : vector<20x128xf32>
    %c0_33 = arith.constant 0 : index
    %c0_34 = arith.constant 0 : index
    %30 = vector.load %arg5[%c0_33, %c0_34] : memref<5x20xf32, #tpu.memory_space<vmem>>, vector<5x20xf32>
    %cst_35 = arith.constant dense<0.000000e+00> : vector<5x128xf32>
    %31 = tpu.matmul %30, %29, %cst_35 {dimension_numbers = #tpu.dot_dimension_numbers<[1], [0], [0], [1], [0, 0, 1, 1], [], []>} : vector<5x20xf32>, vector<20x128xf32>, vector<5x128xf32> -> vector<5x128xf32>
    %c0_36 = arith.constant 0 : index
    %c0_37 = arith.constant 0 : index
    %c0_38 = arith.constant 0 : index
    %32 = vector.load %arg9[%c0_36, %c0_37, %c0_38] : memref<1x20x128xf32, #tpu.memory_space<vmem>>, vector<1x20x128xf32>
    %33 = vector.shape_cast %32 : vector<1x20x128xf32> to vector<20x128xf32>
    %34 = vector.shape_cast %28 : vector<20x128xf32> to vector<1x20x128xf32>
    tpu.vector_store %arg9[%c0_36, %c0_37, %c0_38], %34 {strides = array<i32>} : memref<1x20x128xf32, #tpu.memory_space<vmem>>, vector<1x20x128xf32>,
    %35 = vector.extract_strided_slice %31 {offsets = [0, 0], sizes = [4, 128], strides = [1, 1]} : vector<5x128xf32> to vector<4x128xf32>
    %c0_39 = arith.constant 0 : index
    %c0_40 = arith.constant 0 : index
    %c0_41 = arith.constant 0 : index
    %36 = vector.load %arg8[%c0_39, %c0_40, %c0_41] : memref<1x4x128xf32, #tpu.memory_space<vmem>>, vector<1x4x128xf32>
    %37 = vector.shape_cast %36 : vector<1x4x128xf32> to vector<4x128xf32>
    %38 = vector.shape_cast %35 : vector<4x128xf32> to vector<1x4x128xf32>
    tpu.vector_store %arg8[%c0_39, %c0_40, %c0_41], %38 {strides = array<i32>} : memref<1x4x128xf32, #tpu.memory_space<vmem>>, vector<1x4x128xf32>,
    %39 = vector.extract_strided_slice %31 {offsets = [4, 0], sizes = [1, 128], strides = [1, 1]} : vector<5x128xf32> to vector<1x128xf32>
    %c0_42 = arith.constant 0 : index
    %c0_43 = arith.constant 0 : index
    %40 = vector.load %arg6[%c0_42, %c0_43] : memref<1x1xf32, #tpu.memory_space<vmem>>, vector<1x1xf32>
    %41 = vector.extract %40[0, 0] : f32 from vector<1x1xf32>
    %42 = vector.broadcast %41 : f32 to vector<1x128xf32>
    %43 = arith.addf %39, %42 : vector<1x128xf32>
    %c0_44 = arith.constant 0 : index
    %c0_45 = arith.constant 0 : index
    %c0_46 = arith.constant 0 : index
    %44 = vector.load %arg7[%c0_44, %c0_45, %c0_46] : memref<1x1x128xf32, #tpu.memory_space<vmem>>, vector<1x1x128xf32>
    %45 = vector.shape_cast %44 : vector<1x1x128xf32> to vector<1x128xf32>
    %46 = vector.shape_cast %43 : vector<1x128xf32> to vector<1x1x128xf32>
    tpu.vector_store %arg7[%c0_44, %c0_45, %c0_46], %46 {strides = array<i32>} : memref<1x1x128xf32, #tpu.memory_space<vmem>>, vector<1x1x128xf32>,
    return
  }
  func.func @transform_0(%arg0: i32) -> (i32, i32, i32) {
    %c0_i32 = arith.constant 0 : i32
    %c0_i32_0 = arith.constant 0 : i32
    %c0_i32_1 = arith.constant 0 : i32
    return %arg0, %c0_i32, %c0_i32_0 : i32, i32, i32
  }
  func.func @transform_1(%arg0: i32) -> (i32, i32) {
    %c0_i32 = arith.constant 0 : i32
    %c0_i32_0 = arith.constant 0 : i32
    %c0_i32_1 = arith.constant 0 : i32
    return %c0_i32, %c0_i32_0 : i32, i32
  }
  func.func @transform_2(%arg0: i32) -> (i32, i32) {
    %c0_i32 = arith.constant 0 : i32
    %c0_i32_0 = arith.constant 0 : i32
    %c0_i32_1 = arith.constant 0 : i32
    return %c0_i32, %c0_i32_0 : i32, i32
  }
  func.func @transform_3(%arg0: i32) -> (i32, i32) {
    %c0_i32 = arith.constant 0 : i32
    %c0_i32_0 = arith.constant 0 : i32
    %c0_i32_1 = arith.constant 0 : i32
    return %c0_i32, %c0_i32_0 : i32, i32
  }
  func.func @transform_4(%arg0: i32) -> (i32, i32) {
    %c0_i32 = arith.constant 0 : i32
    %c0_i32_0 = arith.constant 0 : i32
    %c0_i32_1 = arith.constant 0 : i32
    return %c0_i32, %c0_i32_0 : i32, i32
  }
  func.func @transform_5(%arg0: i32) -> (i32, i32) {
    %c0_i32 = arith.constant 0 : i32
    %c0_i32_0 = arith.constant 0 : i32
    %c0_i32_1 = arith.constant 0 : i32
    return %c0_i32, %c0_i32_0 : i32, i32
  }
  func.func @transform_6(%arg0: i32) -> (i32, i32, i32) {
    %c0_i32 = arith.constant 0 : i32
    %c0_i32_0 = arith.constant 0 : i32
    %c0_i32_1 = arith.constant 0 : i32
    return %arg0, %c0_i32, %c0_i32_0 : i32, i32, i32
  }
  func.func @transform_7(%arg0: i32) -> (i32, i32, i32) {
    %c0_i32 = arith.constant 0 : i32
    %c0_i32_0 = arith.constant 0 : i32
    %c0_i32_1 = arith.constant 0 : i32
    return %arg0, %c0_i32, %c0_i32_0 : i32, i32, i32
  }
  func.func @transform_8(%arg0: i32) -> (i32, i32, i32) {
    %c0_i32 = arith.constant 0 : i32
    %c0_i32_0 = arith.constant 0 : i32
    %c0_i32_1 = arith.constant 0 : i32
    return %arg0, %c0_i32, %c0_i32_0 : i32, i32, i32
  }
}

</mosaic_0001>

<bundles_post_ra>
// kernel: tpu_custom_call.1
= control target key start
LH: loop header
LB: loop body
LE: loop exit
PB: predicated region body
PF: predicated region fallthrough
CT: control target
= control target key end

     0   :  { %s1150_s0 = inlined_call_operand.vmem [shape: f32[2,14,128], index: 0, kind: input, shape index: {}]   ;;  %s1151_s1 = inlined_call_operand.vmem [shape: f32[8,14], index: 1, kind: input, shape index: {}]   ;;  %s1152_s2 = inlined_call_operand.vmem [shape: f32[20,64], index: 2, kind: input, shape index: {}]   ;;  %s1153_s3 = inlined_call_operand.vmem [shape: f32[20,1], index: 3, kind: input, shape index: {}]   ;;  %s1154_s4 = inlined_call_operand.vmem [shape: f32[5,20], index: 4, kind: input, shape index: {}]   ;;  %s1155_s5 = inlined_call_operand.<no memory space> [shape: f32[1,1], index: 5, kind: input, shape index: {}]   ;;  %s1156_s6 = inlined_call_operand.hbm [shape: f32[2,1,128], index: 6, kind: output, shape index: {0}]   ;;  %s1157_s7 = inlined_call_operand.hbm [shape: f32[2,4,128], index: 7, kind: output, shape index: {1}]   ;;  %s1158_s8 = inlined_call_operand.vmem [shape: f32[2,20,128], index: 8, kind: output, shape index: {2}]  }
   0x1   :  { %1159 = sst [smem:[#allocation11_spill]] %s1150_s0  ;;  %v14_v0 = vstv %s1155_s5 }
   0x2   :  { %1160 = sst [smem:[#allocation12_spill]] %s1151_s1  ;;  %15 = vst [vmem:[#allocation4] sm:$0x1] %v14_v0 }
   0x3   :  { %16 = vsyncpa [#allocation6], 0 }
   0x4   :  { %18 = vsyncpa [#allocation6 + $0x1], 0 }
   0x5   :  { %19 = vsyncpa [#allocation8], 0 }
   0x6   :  { %21 = vsyncpa [#allocation8 + $0x1], 0  ;;  %s996_s29 = smov 0   ;;  %s998_s30 = smov 0  }
   0x7   :  { %s1000_s9 = smov 0   ;;  %s1002_s10 = smov 0  }
   0x8 LB: > { %s1017_s5 = sadd.s32 4294967295, %s937_s10   ;;  %s707_s11 = sadd.s32 4294967294, %s937_s10   ;;  %s937_s10 = sphi %s1002_s10, %s1168_s10   ;;  %s933_s9 = sphi %s1000_s9, %s1167_s9   ;;  %s929_s30 = sphi %s998_s30, %s1166_s30   ;;  %s925_s29 = sphi %s996_s29, %s1165_s29  }
   0x9   : > { %s1021_s12 = sadd.s32 1, %s937_s10   ;;  %s165_s13 = sadd.s32 1, %s933_s9 }
   0xa   : > { %s162_s14 = ssub.s32 %s937_s10, %s1021_s12  ;;  %p175_p0 = scmp.ne.s32.totalorder %s933_s9, %s929_s30 }
   0xb   : > { %p163_p1 = scmp.eq.s32.totalorder %s162_s14, 0  ;;  %p176_p2 = scmp.eq.s32.totalorder %s1017_s5, 1 }
   0xc   : > { %p181_p3 = scmp.ne.s32.totalorder %s929_s30, %s925_s29  ;;  %p182_p4 = scmp.eq.s32.totalorder %s707_s11, 1 }
   0xd   : > { %s1032_s15 = scalar_select %p163_p1, %s933_s9, %s165_s13  }
   0xe   : > { %p1034_p5 = por %p176_p2, %p175_p0  ;;  %p1038_p6 = por %p182_p4, %p181_p3 }
   0xf   : > { %p710_p7 = scmp.ge.s32.totalorder %s937_s10, 1  ;;  %p275_p8 = scmp.lt.s32.totalorder %s937_s10, 3 }
  0x11   : > { %p276_p9 = pnand %p710_p7, %p275_p8 }
  0x12   : > { %p318_p10 = scmp.lt.s32.totalorder (!%p276_p9), %s1017_s5, 1  ;;  %s1163_s0 = sld [smem:[#allocation11_spill]] (!%p276_p9) }
  0x13   : > { %279 = sbr.rel (%p276_p9) target bundleno = 599 (0x257), region = 44  ;;  %s1164_s1 = sld [smem:[#allocation12_spill]] (!%p276_p9) }
  0x14   : > { %s940_s25 = smov (!%p276_p9), 7   ;;  %s941_s26 = smov (!%p276_p9), 5  }
  0x15   : > { %s942_s27 = smov (!%p276_p9), 3   ;;  %s943_s28 = smov (!%p276_p9), 6  }
  0x16   : > { %s944_s11 = smov (!%p276_p9), 4   ;;  %s945_s13 = smov (!%p276_p9), 2  }
  0x17   : > { %s946_s14 = smov (!%p276_p9), 1   ;;  %s1087_s23 = sand.u32 (!%p276_p9), 1, %s929_s30  }
  0x18   : > { %s1046_s18 = scalar_select %p318_p10, %s1017_s5, 1  ;;  %vm335_vm0 = vcmask 1045504   ;;  %vm331_vm1 = vcmask 113664   ;;  %vm359_vm2 = vcmask 1048520   ;;  %v939_v4 = vmov 0.0   ;;  %v459_v10 = vld [vmem:[%s1153_s3] sm:$0xff] }
  0x19   : > { %v328_v3 = vld [vmem:[%s1164_s1] sm:$0xff]  ;;  %360 = vst.msk [vmem:[#allocation2] sm:$0xff] %vm359_vm2, %v939_v4  ;;  %v461_v8 = vld [vmem:[%s1153_s3 + $0x10] sm:$0xf]  ;;  %v947_v9 = vmov 0   ;;  %v460_v11 = vld [vmem:[%s1153_s3 + $0x8] sm:$0xff] }
  0x1a   : > { %s726_s19 = sshll.u32 %s1046_s18, 4  ;;  %834 = vset.pattern.permute.xlu1 %v947_v9  ;;  %836 = vset.pattern.permute.xlu0 %v947_v9  ;;  %vm444_vm3 = vcmask 56320   ;;  %vm432_vm4 = vcmask 48128   ;;  %vm420_vm5 = vcmask 39936   ;;  %vm408_vm6 = vcmask 31744   ;;  %v449_v40 = vld [vmem:[%s1152_s2 + $0x8] sm:$0xff] }
  0x1b   : > { %s322_s22 = scalar_lea.vmem %s1163_s0, %s726_s19  ;;  %835 = vset.pattern.permute.xlu2 %v947_v9  ;;  %vm396_vm7 = vcmask 23552   ;;  %vm384_vm8 = vcmask 15360   ;;  %vm372_vm9 = vcmask 7168   ;;  %v450_v41 = vld [vmem:[%s1152_s2 + $0x10] sm:$0xf]  ;;  %vm477_vm10 = vcmask 523264  }
  0x1c   : > { %v330_v1 = vld [vmem:[%s322_s22 + $0x8] sm:$0x3f]  ;;  %v329_v2 = vld [vmem:[%s322_s22] sm:$0xff]  ;;  %v549_v43 = vld [vmem:[#allocation4] sm:$0x1]  ;;  %vm521_vm11 = vcmask 1043456  }
  0x1d   : > { %715 = vmatpush.msk.msra.mxu2 %vm335_vm0, %v330_v1  ;;  %v448_v42 = vld [vmem:[%s1152_s2] sm:$0xff]  ;;  %744 = vpush %v549_v43  ;;  %vm517_vm12 = vcmask 162816   ;;  %s711_s24 = sshll.u32 %s1087_s23, 2  ;;  %s303_s22 = scalar_lea.vmem [#allocation5], %s1087_s23 }
  0x1e   : > { %v516_v56 = vld [vmem:[%s1154_s4] sm:$0x1f]  ;;  %s310_s20 = scalar_lea.vmem [#allocation7], %s711_s24  ;;  %s1099_s0 = sshll.u32 %s303_s22, 4  ;;  %s576_s0 = int_to_ptr.vmem [resolvable:$true] %s1099_s0 }
  0x1f   : > { %354 = vmatpush.msra.mxu2 %v329_v2 }
  0x20   : > { %716 = vmatmul.msk.f32.vlgmr.msra.gmra.mxu2 %vm331_vm1, %v328_v3  ;;  %v436_v5 = vld [vmem:[#allocation2] sm:$0xff] }
  0x4e   : > { %s745_s19 = spop %744 }
  0x4f   : > { %v551_v57 = vstv %s745_s19 }
  0xa3   : > { %v1055_v6 = vpop.f32.mrf.mxu2 }
  0xa4   : > { %v799_v7 = vpack.i.bf16 %v1055_v6, %v436_v5 }
  0xa6   : > { %800 = vrot.lane.b32.xlu0 %v799_v7, %s940_s25  ;;  %810 = vrot.lane.b32.xlu1 %v799_v7, %s941_s26  ;;  %s723_s25 = sshll.u32 %s1017_s5, 2 }
  0xa7   : > { %820 = vrot.lane.b32.xlu2 %v799_v7, %s942_s27 }
  0xae   : > { %805 = vrot.lane.b32.xlu0 %v799_v7, %s943_s28  ;;  %815 = vrot.lane.b32.xlu1 %v799_v7, %s944_s11  ;;  %s587_s28 = scalar_lea.hbm %s1157_s7, %s723_s25 }
  0xaf   : > { %825 = vrot.lane.b32.xlu2 %v799_v7, %s945_s13 }
  0xb6   : > { %830 = vrot.lane.b32.xlu0 %v799_v7, %s946_s14  ;;  %474 = vperm.xlu1 %834, %v461_v8   ;;  %s743_s14 = smul.u32 24, %s1046_s18  ;;  %s591_s18 = sshll.u32 %s587_s28, 4  ;;  %s592_s18 = int_to_ptr.hbm [resolvable:$true] %s591_s18 }
  0xb7   : > { %469 = vperm.xlu2 %835, %v460_v11   ;;  %s857_s24 = sshra.s32 %s592_s18, 4  ;;  %s863_s28 = scalar_lea.hbm %s1157_s7, 8  ;;  %s858_s24 = int_to_ptr.hbm [resolvable:$true] %s857_s24 }
  0xb8   : > { %s327_s21 = scalar_lea.vmem %s1158_s8, %s743_s14  ;;  %s573_s14 = scalar_lea.hbm %s1156_s6, %s1017_s5 }
  0xb9   : > { %s1101_s1 = sshll.u32 %s573_s14, 4  ;;  %s559_s5 = scalar_lea.sflag [#allocation8], %s1087_s23  ;;  %s578_s1 = int_to_ptr.hbm [resolvable:$true] %s1101_s1 }
  0xba   : > { %s859_s25 = scalar_lea.hbm %s858_s24, 4  ;;  %p864_p0 = scmp.lt.s32.totalorder %s858_s24, %s1157_s7 }
  0xbb   : > { %p860_p11 = scmp.ne.s32.totalorder %s858_s24, %s859_s25  ;;  %p865_p1 = scmp.lt.s32.totalorder %s863_s28, %s859_s25 }
  0xbd   : > { %p861_p12 = pnand %p860_p11, %p1034_p5  ;;  %p866_p2 = por %p865_p1, %p864_p0 }
  0xbe   : > { %464 = vperm.xlu0 %836, %v459_v10  }
  0xbf   : > { %p862_p13 = pneg %p861_p12 }
  0xc1   : > { %p867_p3 = pnand %p866_p2, %p862_p13 }
 0x101   : > { %v821_v16 = vpop.permute.xlu2 %820 }
 0x102   : > { %v823_v28 = vunpack.i.h.bf16 %v821_v16  ;;  %v822_v29 = vunpack.i.l.bf16 %v821_v16 }
 0x104   : > { %v397_v37 = vsel %vm396_vm7, %v822_v29, %v823_v28 }
 0x109   : > { %v826_v27 = vpop.permute.xlu2 %825 }
 0x10a   : > { %v828_v31 = vunpack.i.h.bf16 %v826_v27  ;;  %v827_v32 = vunpack.i.l.bf16 %v826_v27 }
 0x10c   : > { %v385_v38 = vsel %vm384_vm8, %v827_v32, %v828_v31 }
 0x111   : > { %v470_v44 = vpop.permute.xlu2 %469 }
 0x118   : > { %v801_v12 = vpop.permute.xlu0 %800  ;;  %v811_v13 = vpop.permute.xlu1 %810 }
 0x119   : > { %v803_v14 = vunpack.i.h.bf16 %v801_v12  ;;  %v802_v15 = vunpack.i.l.bf16 %v801_v12  ;;  %v813_v20 = vunpack.i.h.bf16 %v811_v13  ;;  %v812_v21 = vunpack.i.l.bf16 %v811_v13 }
 0x11b   : > { %v445_v17 = vsel %vm444_vm3, %v802_v15, %v803_v14  ;;  %v421_v30 = vsel %vm420_vm5, %v812_v21, %v813_v20 }
 0x11c   : > { %495 = vmatpush.msra.mxu0 %v445_v17  ;;  %727 = vmatpush.msra.mxu1 %v445_v17 }
 0x11d   : > { %728 = vmatpush.msra.mxu3 %v445_v17 }
 0x120   : > { %v806_v18 = vpop.permute.xlu0 %805  ;;  %v816_v19 = vpop.permute.xlu1 %815 }
 0x121   : > { %v808_v22 = vunpack.i.h.bf16 %v806_v18  ;;  %v807_v23 = vunpack.i.l.bf16 %v806_v18  ;;  %v818_v24 = vunpack.i.h.bf16 %v816_v19  ;;  %v817_v25 = vunpack.i.l.bf16 %v816_v19 }
 0x123   : > { %v433_v26 = vsel %vm432_vm4, %v807_v23, %v808_v22  ;;  %v409_v33 = vsel %vm408_vm6, %v817_v25, %v818_v24 }
 0x124   : > { %496 = vmatpush.msra.mxu0 %v433_v26  ;;  %729 = vmatpush.msra.mxu1 %v433_v26 }
 0x125   : > { %730 = vmatpush.msra.mxu3 %v433_v26 }
 0x126   : > { %497 = vmatpush.msra.mxu0 %v421_v30  ;;  %731 = vmatpush.msra.mxu1 %v421_v30 }
 0x127   : > { %732 = vmatpush.msra.mxu3 %v421_v30 }
 0x128   : > { %498 = vmatpush.msra.mxu0 %v409_v33  ;;  %733 = vmatpush.msra.mxu1 %v409_v33  ;;  %v831_v34 = vpop.permute.xlu0 %830  ;;  %v475_v50 = vpop.permute.xlu1 %474 }
 0x129   : > { %734 = vmatpush.msra.mxu3 %v409_v33  ;;  %v833_v35 = vunpack.i.h.bf16 %v831_v34  ;;  %v832_v36 = vunpack.i.l.bf16 %v831_v34 }
 0x12a   : > { %499 = vmatpush.msra.mxu0 %v397_v37  ;;  %735 = vmatpush.msra.mxu1 %v397_v37 }
 0x12b   : > { %736 = vmatpush.msra.mxu3 %v397_v37  ;;  %v373_v39 = vsel %vm372_vm9, %v832_v36, %v833_v35 }
 0x12c   : > { %500 = vmatpush.msra.mxu0 %v385_v38  ;;  %737 = vmatpush.msra.mxu1 %v385_v38 }
 0x12d   : > { %738 = vmatpush.msra.mxu3 %v385_v38 }
 0x12e   : > { %501 = vmatpush.msra.mxu0 %v373_v39  ;;  %739 = vmatpush.msra.mxu1 %v373_v39 }
 0x12f   : > { %740 = vmatpush.msra.mxu3 %v373_v39 }
 0x130   : > { %502 = vmatpush.msra.mxu0 %v1055_v6  ;;  %741 = vmatpush.msra.mxu1 %v1055_v6  ;;  %v465_v45 = vpop.permute.xlu0 %464 }
 0x131   : > { %742 = vmatpush.msra.mxu3 %v1055_v6  ;;  %718 = vmatmul.msk.f32.vlgmr.msra.gmra.mxu1 %vm477_vm10, %v449_v40 }
 0x132   : > { %719 = vmatmul.msk.f32.vlgmr.msra.gmra.mxu3 %vm477_vm10, %v450_v41  ;;  %717 = vmatmul.msk.f32.vlgmr.msra.gmra.mxu0 %vm477_vm10, %v448_v42 }
 0x1ae   : > { %v507_v46 = vpop.f32.mrf.mxu1 }
 0x1af   : > { %v508_v47 = vadd.f32 %v507_v46, %v470_v44  ;;  %v504_v48 = vpop.f32.mrf.mxu0 }
 0x1b0   : > { %v505_v49 = vadd.f32 %v504_v48, %v465_v45 }
 0x1b1   : > { %546 = vst [vmem:[%s327_s21 + $0x8] sm:$0xff] %v508_v47  ;;  %837 = vtanh.f32 %v508_v47 }
 0x1b2   : > { %545 = vst [vmem:[%s327_s21] sm:$0xff] %v505_v49 }
 0x1b5   : > { %v510_v51 = vpop.f32.mrf.mxu3 }
 0x1b6   : > { %v511_v52 = vadd.f32 %v510_v51, %v475_v50 }
 0x1b7   : > { %v838_v53 = vpop.eup %837 }
 0x1b8   : > { %839 = vtanh.f32 %v511_v52  ;;  %547 = vst [vmem:[%s327_s21 + $0x10] sm:$0xf] %v511_v52  ;;  %s589_s21 = sshll.u32 %s310_s20, 4  ;;  %s590_s21 = int_to_ptr.vmem [resolvable:$true] %s589_s21 }
 0x1b9   : > { %841 = vtanh.f32 %v505_v49 }
 0x1be   : > { %v840_v54 = vpop.eup %839 }
 0x1bf   : > { %720 = vmatpush.msk.msrb.mxu2 %vm521_vm11, %v840_v54  ;;  %v842_v55 = vpop.eup %841 }
 0x1c1   : > { %539 = vmatpush.msrb.mxu2 %v838_v53 }
 0x1c3   : > { %540 = vmatpush.msrb.mxu2 %v842_v55 }
 0x1c4   : > { %721 = vmatmul.msk.f32.vlgmr.msrb.gmra.mxu2 %vm517_vm12, %v516_v56 }
 0x247   : > { %v542_v58 = vpop.f32.mrf.mxu2 }
 0x248   : > { %548 = vst [vmem:[%s310_s20] sm:$0xf] %v542_v58  ;;  %v552_v59 = vadd.f32 %v551_v57, %v542_v58 }
 0x249   : > { %870 = shalt.err (!%p867_p3)
}
 0x24a   : > { %747 = dma.vmem_to_hbm [thread:$0]  (%p1034_p5), %s590_s21, 64, %s592_s18, %s559_s5   ;;  %553 = vst [vmem:[%s303_s22 - $0x4] sm:$0x10] %v552_v59 }
 0x24b   : > { %s555_s14 = scalar_lea.sflag [#allocation6], %s1087_s23  ;;  %s885_s19 = sshra.s32 %s578_s1, 4  ;;  %s886_s19 = int_to_ptr.hbm [resolvable:$true] %s885_s19 }
 0x24c   : > { %s887_s20 = scalar_lea.hbm %s886_s19, 1  ;;  %s891_s26 = scalar_lea.hbm %s1156_s6, 2 }
 0x24d   : > { %p888_p4 = scmp.ne.s32.totalorder %s886_s19, %s887_s20  ;;  %p892_p9 = scmp.lt.s32.totalorder %s886_s19, %s1156_s6 }
 0x24e   : > { %p893_p10 = scmp.lt.s32.totalorder %s891_s26, %s887_s20 }
 0x24f   : > { %p889_p7 = pnand %p888_p4, %p1034_p5 }
 0x250   : > { %p894_p11 = por %p893_p10, %p892_p9 }
 0x251   : > { %p890_p8 = pneg %p889_p7 }
 0x253   : > { %p895_p12 = pnand %p894_p11, %p890_p8 }
 0x255   : > { %898 = shalt.err (!%p895_p12)
}
 0x256   : > { %746 = dma.vmem_to_hbm [thread:$0]  (%p1034_p5), %s576_s0, 16, %s578_s1, %s555_s14  }
 0x257 PF: > { %p757_p13 = scmp.ge.s32.totalorder %s937_s10, 2  ;;  %s606_s23 = sand.u32 1, %s925_s29  }
 0x258   : > { %s607_s21 = scalar_lea.sflag [#allocation6], %s606_s23 }
 0x259   : > { %p751_p0 = pnand %p757_p13, %p1038_p6 }
 0x25b   : > { %p752_p1 = pneg %p751_p0 }
 0x25d   : > { %916 = dma.done.wait (%p752_p1), %s607_s21, 16  }
 0x25e   : > { %918 = vsyncadd (%p752_p1), %s607_s21, 4294967280  ;;  %s616_s18 = scalar_lea.sflag [#allocation8], %s606_s23 }
 0x25f   : > { %920 = dma.done.wait (%p752_p1), %s616_s18, 64  }
 0x260   : > { %922 = vsyncadd (%p752_p1), %s616_s18, 4294967232  ;;  %p24_p5 = scmp.ge.s32.totalorder %s1021_s12, 4   ;;  %s1165_s29 = smov %s929_s30 }
 0x261   : > { %s1166_s30 = smov %s933_s9  ;;  %s1167_s9 = smov %s1032_s15 }
 0x262   : > { %s1168_s10 = smov %s1021_s12  ;;  %26 = sbr.rel (!%p24_p5) target bundleno = 8 (0x8), region = 108 }
 0x267   :  { %630 = vsyncpa [#allocation6], 1 }
 0x268   :  { %632 = vsyncpa [#allocation6 + $0x1], 1 }
 0x269   :  { %633 = vsyncpa [#allocation8], 1 }
 0x26a   :  { %635 = vsyncpa [#allocation8 + $0x1], 1 }

</bundles_post_ra>
